<compile_context>
chip_gen: v7x
topology: tpu7x:2x2x1
jax: 0.10.0
libtpu: 0.0.40
codegen_flags: <defaults>
</compile_context>

<pallas_src>
import jax
import jax.numpy as jnp
from jax import lax
from jax.experimental import pallas as pl
from jax.experimental.pallas import tpu as pltpu


def _round_up(x: int, m: int) -> int:
    return ((x + m - 1) // m) * m


# ---------------------------------------------------------------------------
# Node-level transform: zW = z @ W   (2*N*D^2 FLOPs on the MXU, done once)
# ---------------------------------------------------------------------------
def _node_transform_kernel(z_ref, w_ref, o_ref):
    # z_ref: (TN, D), w_ref: (D, D), o_ref: (TN, D)
    o_ref[...] = jnp.dot(
        z_ref[...], w_ref[...], preferred_element_type=jnp.float32
    ).astype(o_ref.dtype)


def _node_transform(z, weight, *, tile_n=512):
    n, d = z.shape
    n8 = _round_up(n, 8)
    tn = min(_round_up(tile_n, 8), n8)
    n_pad = _round_up(n8, tn)
    z_p = jnp.pad(z, ((0, n_pad - n), (0, 0))) if n_pad != n else z

    return pl.pallas_call(
        _node_transform_kernel,
        out_shape=jax.ShapeDtypeStruct((n_pad, d), jnp.float32),
        grid_spec=pltpu.PrefetchScalarGridSpec(
            num_scalar_prefetch=0,
            grid=(n_pad // tn,),
            in_specs=[
                pl.BlockSpec((tn, d), lambda i: (i, 0)),   # node tile
                pl.BlockSpec((d, d), lambda i: (0, 0)),    # W resident in VMEM
            ],
            out_specs=pl.BlockSpec((tn, d), lambda i: (i, 0)),
        ),
        compiler_params=pltpu.CompilerParams(
            dimension_semantics=("parallel",),
            vmem_limit_bytes=32 << 20,
        ),
    )(z_p, weight)


# ---------------------------------------------------------------------------
# Edge tile sizing: ~2 MiB per streamed input block, lane-aligned, capped.
# ---------------------------------------------------------------------------
def _edge_tile(e, d, n_resident=None, *, max_tile=8192, target_bytes=2 << 20):
    e128 = _round_up(max(e, 1), 128)
    te = (target_bytes // max(d * 4, 1)) // 128 * 128
    te = max(128, min(te, max_tile))
    if n_resident is not None:
        # Keep the in-kernel one-hot (TE, N_res) f32 intermediates <= ~4 MiB.
        cap = ((4 << 20) // max(n_resident * 4, 1)) // 128 * 128
        te = max(128, min(te, cap))
    return min(te, e128)


# ---------------------------------------------------------------------------
# Fused edge kernel: resident zW / z, in-kernel one-hot MXU gather.
#   score = sum_d zW[src, d] * z[dst, d] + b
# ---------------------------------------------------------------------------
def _edge_score_fused_kernel(src_ref, dst_ref, zw_ref, z_ref, b_ref, o_ref):
    # src_ref/dst_ref: (1, 1, TE) int32 edge endpoints for this tile
    # zw_ref/z_ref:    (N_res, D) f32, resident across the whole grid
    # b_ref:           (1,) bias in SMEM; o_ref: (1, 1, TE) lane-dense scores
    te = src_ref.shape[-1]
    n_res = zw_ref.shape[0]

    # Indices as f32 (exact for < 2^24 nodes) -> sublane column via relayout.
    src_col = jnp.transpose(src_ref[0].astype(jnp.float32), (1, 0))   # (TE, 1)
    dst_col = jnp.transpose(dst_ref[0].astype(jnp.float32), (1, 0))   # (TE, 1)
    lane = lax.broadcasted_iota(jnp.int32, (te, n_res), 1).astype(jnp.float32)

    oh_src = (lane == src_col).astype(jnp.float32)                    # (TE, N_res)
    oh_dst = (lane == dst_col).astype(jnp.float32)                    # (TE, N_res)

    # One-hot gather on the MXU: xg = zW[src], yg = z[dst].
    xg = jnp.dot(oh_src, zw_ref[...], preferred_element_type=jnp.float32)
    yg = jnp.dot(oh_dst, z_ref[...], preferred_element_type=jnp.float32)

    s = jnp.sum(xg * yg, axis=-1, keepdims=True)                      # (TE, 1)
    # Relayout to lane-dense (1, TE); add bias AFTER the transpose (lane-dense).
    o_ref[0] = (jnp.transpose(s, (1, 0)) + b_ref[0]).astype(o_ref.dtype)


# ---------------------------------------------------------------------------
# Streaming edge kernel (fallback for large N): operands gathered outside.
# ---------------------------------------------------------------------------
def _edge_score_stream_kernel(xw_ref, y_ref, b_ref, o_ref):
    # xw_ref: (TE, D) = zW[src] tile, y_ref: (TE, D) = z[dst] tile
    s = jnp.sum(xw_ref[...] * y_ref[...], axis=-1, keepdims=True)     # (TE, 1)
    o_ref[0] = (jnp.transpose(s, (1, 0)) + b_ref[0]).astype(o_ref.dtype)


# ---------------------------------------------------------------------------
# Wrapper
# ---------------------------------------------------------------------------
def link_decoder_pallas(z, edge_index, weight, bias, *,
                        tile_n=512, max_fused_nodes=1024):
    """z: (N, D); edge_index: (2, E) int; weight: (D, D); bias: () -> (E,)."""
    src = edge_index[0].astype(jnp.int32)
    dst = edge_index[1].astype(jnp.int32)
    e = int(src.shape[0])
    n, d = z.shape

    z = z.astype(jnp.float32)
    weight = weight.astype(jnp.float32)

    # Apply the bilinear weight once per node (Pallas MXU kernel).
    zw = _node_transform(z, weight, tile_n=tile_n)          # (n_pad8, D) f32
    n_pad8 = zw.shape[0]
    b1 = jnp.asarray(bias, dtype=jnp.float32).reshape((1,))

    # Residency / fusion gate: small-enough node tables live fully in VMEM
    # (comfortable on v7x's 64 MiB, v6e/v5e's 128 MiB); larger graphs stream.
    table_bytes = 2 * n_pad8 * d * 4
    use_fused = (n_pad8 <= max_fused_nodes) and (table_bytes * 2 <= (32 << 20))

    te = _edge_tile(e, d, n_resident=n_pad8 if use_fused else None)
    e_pad = _round_up(max(e, 1), te)
    num_tiles = e_pad // te

    # Pad the (E,) index vectors (cheap), NOT the gathered (E, D) arrays.
    # Padded rows score zW[0]·z[0] + b and are sliced off below ([:e]).
    if e_pad != e:
        src = jnp.pad(src, (0, e_pad - e))
        dst = jnp.pad(dst, (0, e_pad - e))

    compiler_params = pltpu.CompilerParams(
        dimension_semantics=("parallel",),   # lets v7x shard edge tiles over TCs
        vmem_limit_bytes=48 << 20,
    )

    if use_fused:
        z_res = jnp.pad(z, ((0, n_pad8 - n), (0, 0))) if n_pad8 != n else z
        src3 = src.reshape(num_tiles, 1, te)
        dst3 = dst.reshape(num_tiles, 1, te)
        out = pl.pallas_call(
            _edge_score_fused_kernel,
            out_shape=jax.ShapeDtypeStruct((num_tiles, 1, te), jnp.float32),
            grid_spec=pltpu.PrefetchScalarGridSpec(
                num_scalar_prefetch=0,
                grid=(num_tiles,),
                in_specs=[
                    pl.BlockSpec((1, 1, te), lambda i: (i, 0, 0)),      # src ids
                    pl.BlockSpec((1, 1, te), lambda i: (i, 0, 0)),      # dst ids
                    pl.BlockSpec((n_pad8, d), lambda i: (0, 0)),        # zW resident
                    pl.BlockSpec((n_pad8, d), lambda i: (0, 0)),        # z  resident
                    pl.BlockSpec(memory_space=pltpu.MemorySpace.SMEM),  # bias
                ],
                out_specs=pl.BlockSpec((1, 1, te), lambda i: (i, 0, 0)),
            ),
            compiler_params=compiler_params,
        )(src3, dst3, zw, z_res, b1)
    else:
        # Streaming fallback: contiguous row gathers emit e_pad rows directly.
        xw = zw[src]                                           # (e_pad, D)
        y = z[dst]                                             # (e_pad, D)
        out = pl.pallas_call(
            _edge_score_stream_kernel,
            out_shape=jax.ShapeDtypeStruct((num_tiles, 1, te), jnp.float32),
            grid_spec=pltpu.PrefetchScalarGridSpec(
                num_scalar_prefetch=0,
                grid=(num_tiles,),
                in_specs=[
                    pl.BlockSpec((te, d), lambda i: (i, 0)),            # zW[src]
                    pl.BlockSpec((te, d), lambda i: (i, 0)),            # z[dst]
                    pl.BlockSpec(memory_space=pltpu.MemorySpace.SMEM),  # bias
                ],
                out_specs=pl.BlockSpec((1, 1, te), lambda i: (i, 0, 0)),
            ),
            compiler_params=compiler_params,
        )(xw, y, b1)

    return out.reshape(-1)[:e]  # squeeze + drop edge padding


if __name__ == "__main__":
    key = jax.random.PRNGKey(0)
    k_z, k_w, k_b, k_src, k_dst = jax.random.split(key, 5)

    num_nodes = 8
    hid_dim = 32
    num_edges = 16

    z = jax.random.normal(k_z, (num_nodes, hid_dim), dtype=jnp.float32)

    # nn.Bilinear(hid_dim, hid_dim, 1) init: U(-1/sqrt(hid_dim), 1/sqrt(hid_dim))
    bound = 1.0 / jnp.sqrt(jnp.float32(hid_dim))
    weight = jax.random.uniform(k_w, (hid_dim, hid_dim), jnp.float32, -bound, bound)
    bias = jax.random.uniform(k_b, (), jnp.float32, -bound, bound)

    src = jax.random.randint(k_src, (num_edges,), 0, num_nodes, dtype=jnp.int32)
    dst = jax.random.randint(k_dst, (num_edges,), 0, num_nodes, dtype=jnp.int32)
    edge_index = jnp.stack([src, dst], axis=0)  # (2, E)

    # Pure-JAX reference of torch.nn.Bilinear with out_features=1
    ref = jnp.einsum("ei,ij,ej->e", z[src], weight, z[dst]) + bias

    # Fused path (resident zW/z + in-kernel one-hot MXU gather) — default here.
    scores_fused = jax.block_until_ready(
        link_decoder_pallas(z, edge_index, weight, bias))
    assert scores_fused.shape == (num_edges,)
    assert jnp.allclose(scores_fused, ref, atol=1e-4, rtol=1e-4)

    # Streaming fallback path (used for large-N graphs) — forced for coverage.
    scores_stream = jax.block_until_ready(
        link_decoder_pallas(z, edge_index, weight, bias, max_fused_nodes=0))
    assert scores_stream.shape == (num_edges,)
    assert jnp.allclose(scores_stream, ref, atol=1e-4, rtol=1e-4)

    print("KERNEL_OK")
</pallas_src>

<mosaic_0001>
module attributes {stable_mosaic.version = 11 : i64} {
  func.func @_node_transform_kernel(%arg0: i32, %arg1: memref<8x32xf32, #tpu.memory_space<vmem>>, %arg2: memref<32x32xf32, #tpu.memory_space<vmem>>, %arg3: memref<8x32xf32, #tpu.memory_space<vmem>>) attributes {dimension_semantics = [#tpu.dimension_semantics<parallel>], iteration_bounds = array<i64: 1>, scalar_prefetch = 0 : i64, scratch_operands = 0 : i64, tpu.core_type = #tpu.core_type<tc>, window_params = [{transform_indices = @transform_0, window_bounds = array<i64: 8, 32>}, {pipeline_mode = #tpu.pipeline_mode<synchronous>, transform_indices = @transform_1, window_bounds = array<i64: 32, 32>}, {transform_indices = @transform_2, window_bounds = array<i64: 8, 32>}]} {
    %c0 = arith.constant 0 : index
    %c0_0 = arith.constant 0 : index
    %0 = vector.load %arg1[%c0, %c0_0] : memref<8x32xf32, #tpu.memory_space<vmem>>, vector<8x32xf32>
    %c0_1 = arith.constant 0 : index
    %c0_2 = arith.constant 0 : index
    %1 = vector.load %arg2[%c0_1, %c0_2] : memref<32x32xf32, #tpu.memory_space<vmem>>, vector<32x32xf32>
    %cst = arith.constant dense<0.000000e+00> : vector<8x32xf32>
    %2 = tpu.matmul %0, %1, %cst {dimension_numbers = #tpu.dot_dimension_numbers<[1], [0], [0], [1], [0, 0, 1, 1], [], []>} : vector<8x32xf32>, vector<32x32xf32>, vector<8x32xf32> -> vector<8x32xf32>
    %c0_3 = arith.constant 0 : index
    %c0_4 = arith.constant 0 : index
    %3 = vector.load %arg3[%c0_3, %c0_4] : memref<8x32xf32, #tpu.memory_space<vmem>>, vector<8x32xf32>
    tpu.vector_store %arg3[%c0_3, %c0_4], %2 {strides = array<i32>} : memref<8x32xf32, #tpu.memory_space<vmem>>, vector<8x32xf32>,
    return
  }
  func.func @transform_0(%arg0: i32) -> (i32, i32) {
    %c0_i32 = arith.constant 0 : i32
    %c0_i32_0 = arith.constant 0 : i32
    return %arg0, %c0_i32 : i32, i32
  }
  func.func @transform_1(%arg0: i32) -> (i32, i32) {
    %c0_i32 = arith.constant 0 : i32
    %c0_i32_0 = arith.constant 0 : i32
    %c0_i32_1 = arith.constant 0 : i32
    return %c0_i32, %c0_i32_0 : i32, i32
  }
  func.func @transform_2(%arg0: i32) -> (i32, i32) {
    %c0_i32 = arith.constant 0 : i32
    %c0_i32_0 = arith.constant 0 : i32
    return %arg0, %c0_i32 : i32, i32
  }
}

</mosaic_0001>

<bundles_post_ra>
// kernel: tpu_custom_call.1
= control target key start
LH: loop header
LB: loop body
LE: loop exit
PB: predicated region body
PF: predicated region fallthrough
CT: control target
= control target key end

     0   :  { %7 = vsyncpa [#allocation3], 0  ;;  %s303_s0 = inlined_call_operand.hbm [shape: f32[8,32], index: 0, kind: input, shape index: {}]   ;;  %s304_s1 = inlined_call_operand.hbm [shape: f32[32,32], index: 1, kind: input, shape index: {}]   ;;  %s305_s2 = inlined_call_operand.hbm [shape: f32[8,32], index: 2, kind: output, shape index: {}]  }
   0x1   :  { %8 = vsyncpa [#allocation6], 0 }
   0x2   :  { %9 = vsyncpa [#allocation4], 0  ;;  %s237_s9 = smov [#allocation2]   ;;  %s238_s11 = smov [#allocation5]  }
   0x3   :  { %s16_s10 = sshll.u32 %s237_s9, 4  ;;  %s25_s12 = sshll.u32 %s238_s11, 4  ;;  %s17_s10 = int_to_ptr.vmem [resolvable:$true] %s16_s10  ;;  %s260_s12 = int_to_ptr.vmem [resolvable:$true] %s25_s12 }
   0x4   :  { %s165_s15 = scalar_lea.hbm %s303_s0, 128 }
   0x5   :  { %p166_p0 = scmp.ne.s32.totalorder %s303_s0, %s165_s15  ;;  %p169_p1 = scmp.lt.u32.totalorder %s165_s15, %s303_s0 }
   0x7   :  { %p171_p2 = pnand %p169_p1, %p166_p0 }
   0x9   :  { %174 = shalt.err (!%p171_p2)
}
   0xa   :  { %s175_s20 = scalar_lea.vmem %s17_s10, 128  ;;  %p180_p4 = scmp.lt.s32.totalorder %s17_s10, %s17_s10 }
   0xb   :  { %p176_p3 = scmp.ne.s32.totalorder %s17_s10, %s175_s20  ;;  %p181_p5 = scmp.lt.s32.totalorder %s175_s20, %s175_s20 }
   0xd   :  { %p182_p6 = por %p181_p5, %p180_p4 }
   0xf   :  { %p183_p7 = pnand %p182_p6, %p176_p3 }
  0x11   :  { %186 = shalt.err (!%p183_p7)
}
  0x12   :  { %19 = dma.hbm_to_vmem [thread:$0]  %s303_s0, 128, %s17_s10, [#allocation3]  }
  0x13   :  { %s187_s25 = scalar_lea.hbm %s304_s1, 512 }
  0x14   :  { %p188_p8 = scmp.ne.s32.totalorder %s304_s1, %s187_s25  ;;  %p191_p9 = scmp.lt.u32.totalorder %s187_s25, %s304_s1 }
  0x16   :  { %p193_p10 = pnand %p191_p9, %p188_p8 }
  0x18   :  { %196 = shalt.err (!%p193_p10)
}
  0x19   :  { %s197_s30 = scalar_lea.vmem %s260_s12, 512  ;;  %p202_p12 = scmp.lt.s32.totalorder %s260_s12, %s260_s12 }
  0x1a   :  { %p198_p11 = scmp.ne.s32.totalorder %s260_s12, %s197_s30  ;;  %p203_p13 = scmp.lt.s32.totalorder %s197_s30, %s197_s30 }
  0x1c   :  { %p204_p0 = por %p203_p13, %p202_p12 }
  0x1e   :  { %p205_p1 = pnand %p204_p0, %p198_p11 }
  0x20   :  { %208 = shalt.err (!%p205_p1)
}
  0x21   :  { %s239_s0 = smov 128   ;;  %s240_s3 = smov 8  }
  0x22   :  { %31 = dma.hbm_to_vmem [thread:$0]  %s304_s1, 512, %s260_s12, [#allocation6], %s239_s0, %s239_s0, %s240_s3  }
  0x23   :  { %231 = dma.done.wait [#allocation3], 128  }
  0x24   :  { %232 = vsyncadd [#allocation3], 4294967168 }
  0x25   :  { %233 = dma.done.wait [#allocation6], 512  }
  0x26   :  { %234 = vsyncadd [#allocation6], 4294966784  ;;  %v241_v0 = vmov 0.0|0.0   ;;  %vm242_vm0 = vmmov 0   ;;  %v243_v1 = vmov 0.0   ;;  %v39_v2 = vld [vmem:[#allocation5] sm:$0xff] }
  0x27   :  { %151 = vmatprep.subr.bf16.mxu0 %v241_v0  ;;  %148 = vmatprep.mubr.msk.f32.mxu0 %vm242_vm0, %v243_v1  ;;  %v40_v3 = vld [vmem:[#allocation5 + $0x8] sm:$0xff]  ;;  %v41_v4 = vld [vmem:[#allocation5 + $0x10] sm:$0xff]  ;;  %v42_v6 = vld [vmem:[#allocation5 + $0x18] sm:$0xff]  ;;  %vm43_vm1 = vcmask 261120   ;;  %s244_s1 = smov [#allocation7]  }
  0x28   :  { %v152_v5 = vpack.c.bf16 %v40_v3, %v39_v2  ;;  %v155_v7 = vpack.c.bf16 %v42_v6, %v41_v4  ;;  %v38_v8 = vld [vmem:[#allocation2] sm:$0xff]  ;;  %s124_s6 = sshll.u32 %s244_s1, 4  ;;  %s125_s6 = int_to_ptr.vmem [resolvable:$true] %s124_s6 }
  0x29   :  { %s209_s7 = scalar_lea.vmem %s125_s6, 128  ;;  %p214_p3 = scmp.lt.s32.totalorder %s125_s6, %s125_s6 }
  0x2a   :  { %153 = vmatpush3.bf16.msra.mxu0 %v152_v5  ;;  %p210_p2 = scmp.ne.s32.totalorder %s125_s6, %s209_s7  ;;  %p215_p4 = scmp.lt.s32.totalorder %s209_s7, %s209_s7 }
  0x2b   :  { %154 = vmatprep.subr.bf16.mxu0 %v241_v0 }
  0x2c   :  { %p216_p5 = por %p215_p4, %p214_p3 }
  0x2e   :  { %156 = vmatpush3.bf16.msra.mxu0 %v155_v7  ;;  %p217_p6 = pnand %p216_p5, %p210_p2 }
  0x31   :  { %149 = vmatmul.mubr.msk.f32.vlgmr.msra.gmra.mrb[0].mxu0 %vm43_vm1, %v38_v8 }
 0x104   :  { %v113_v9 = vpop.f32.mrb[0].mxu0 }
 0x105   :  { %117 = vst.msk [vmem:[#allocation7] sm:$0xff] %vm43_vm1, %v113_v9  ;;  %v150_v10 = vpop.f32.mrb[1].mxu0 }
 0x106   :  { %220 = shalt.err (!%p217_p6)
}
 0x107   :  { %s221_s10 = scalar_lea.hbm %s305_s2, 128 }
 0x108   :  { %p222_p7 = scmp.ne.s32.totalorder %s305_s2, %s221_s10  ;;  %p225_p8 = scmp.lt.u32.totalorder %s221_s10, %s305_s2 }
 0x10a   :  { %p227_p9 = pnand %p225_p8, %p222_p7 }
 0x10c   :  { %230 = shalt.err (!%p227_p9)
}
 0x10d   :  { %127 = dma.vmem_to_hbm [thread:$0]  %s125_s6, 128, %s305_s2, [#allocation4]  }
 0x10e   :  { %235 = dma.done.wait [#allocation4], 128  }
 0x10f   :  { %236 = vsyncadd [#allocation4], 4294967168 }
 0x110   :  { %131 = vsyncpa [#allocation3], 1 }
 0x111   :  { %132 = vsyncpa [#allocation6], 1 }
 0x112   :  { %133 = vsyncpa [#allocation4], 1 }

</bundles_post_ra>
